<compile_context>
chip_gen: v6e
topology: v6e:2x2x1
jax: 0.10.0
libtpu: 0.0.40
codegen_flags: <defaults>
</compile_context>

<pallas_src>
import math

import jax
import jax.numpy as jnp
from jax.experimental import pallas as pl
from jax.experimental.pallas import tpu as pltpu


# Native sublane multiple per element size: sub-32-bit dtypes pack along
# sublanes, so unmasked full-vreg stores need 16 rows (bf16/f16) / 32 (int8).
_SUBLANE_BY_ITEMSIZE = {4: 8, 2: 16, 1: 32}

_LANE_CANDIDATES = (4096, 2048, 1024, 512, 256, 128)

_MIN_GRID = 4  # prefer >= 4 grid steps: pipelining + v7x megacore sharding.


def _copy_kernel(x_ref, o_ref):
    # Pure elementwise copy of the current lane-dense tile.
    o_ref[...] = x_ref[...]


def identity_forward(encoded_images: jax.Array) -> jax.Array:
    """Identity noise layer forward: semantic no-op, return input unchanged."""
    return encoded_images


def _choose_block_rows(rows: int, lane: int, itemsize: int, sublane: int,
                       max_block_bytes: int) -> int:
    """Block row count: multiple of `sublane`, <= max_block_bytes per buffer,
    and small enough that the grid has >= _MIN_GRID steps whenever the array
    is big enough for that to matter."""
    bytes_per_row = lane * itemsize
    # Byte cap, rounded down to the sublane multiple.
    cap_bytes = max(sublane, (max_block_bytes // bytes_per_row) // sublane * sublane)
    if rows >= _MIN_GRID * sublane:
        # Minimum-grid cap: at most ceil(rows / _MIN_GRID) rows per block.
        cap_grid = -(-rows // _MIN_GRID)
        cap_grid = max(sublane, (cap_grid // sublane) * sublane)
        block_rows = min(cap_bytes, cap_grid)
    elif rows >= sublane:
        block_rows = sublane
    else:
        # Tiny array: one full-extent block (block == array dims is always legal).
        block_rows = rows
    return min(block_rows, rows)


def _tiled_copy(x2: jax.Array, block_rows: int, lane: int) -> jax.Array:
    rows = x2.shape[0]
    dtype = x2.dtype
    itemsize = jnp.dtype(dtype).itemsize
    block_bytes = block_rows * lane * itemsize
    # Actual requirement: in + out, double-buffered, plus slack for
    # compiler-internal scratch.  Never below the smallest scoped default
    # (16 MiB on v5e) and never above 40 MiB (headroom on v7x's 64 MiB VMEM).
    vmem_limit = min(40 << 20, max(16 << 20, 4 * block_bytes + (2 << 20)))
    grid = (pl.cdiv(rows, block_rows),)
    return pl.pallas_call(
        _copy_kernel,
        out_shape=jax.ShapeDtypeStruct((rows, lane), dtype),
        grid_spec=pltpu.PrefetchScalarGridSpec(
            num_scalar_prefetch=0,
            grid=grid,
            in_specs=[pl.BlockSpec((block_rows, lane), lambda i: (i, 0))],
            out_specs=pl.BlockSpec((block_rows, lane), lambda i: (i, 0)),
        ),
        compiler_params=pltpu.CompilerParams(
            # Single parallel axis: v7x shards the rows across its 2 TCs;
            # harmless no-op on single-TC v5e/v6e.
            dimension_semantics=("parallel",),
            vmem_limit_bytes=vmem_limit,
        ),
    )(x2)


def identity_copy_pallas(encoded_images: jax.Array,
                         *,
                         max_block_bytes: int = 4 << 20) -> jax.Array:
    """Materialized identity copy via Pallas (lane-dense, bounded VMEM tiles)."""
    shape = encoded_images.shape
    dtype = encoded_images.dtype
    total = math.prod(shape)
    if total == 0:
        return encoded_images
    itemsize = jnp.dtype(dtype).itemsize
    sublane = _SUBLANE_BY_ITEMSIZE.get(itemsize, 8)

    # Widest lane dimension (multiple of 128) that divides the element count,
    # so stores are unmasked full-vreg `vst`.
    lane = None
    for cand in _LANE_CANDIDATES:
        if total % cand == 0:
            lane = cand
            break

    if lane is not None:
        rows = total // lane
        x2 = encoded_images.reshape(rows, lane)
        block_rows = _choose_block_rows(rows, lane, itemsize, sublane,
                                        max_block_bytes)
        out = _tiled_copy(x2, block_rows, lane)
        return out.reshape(shape)

    # Odd-sized fallback: element count not a multiple of 128.  Pad the flat
    # view up to a multiple of (sublane * 128), run the same lane-dense tiled
    # path (pipelined, megacore-shardable, unmasked vst), then slice back.
    lane = 128
    chunk = sublane * lane
    padded_total = -(-total // chunk) * chunk
    flat = jnp.pad(encoded_images.reshape(total), (0, padded_total - total))
    rows = padded_total // lane
    x2 = flat.reshape(rows, lane)
    block_rows = _choose_block_rows(rows, lane, itemsize, sublane,
                                    max_block_bytes)
    out = _tiled_copy(x2, block_rows, lane)
    return out.reshape(padded_total)[:total].reshape(shape)


if __name__ == "__main__":
    key = jax.random.PRNGKey(0)
    # Small NCHW input consistent with an image-watermarking pipeline.
    x = jax.random.normal(key, (2, 4, 16, 16), dtype=jnp.float32)

    # Module forward: pure identity, no data movement.
    y = identity_forward(x)
    y = jax.block_until_ready(y)
    assert y.shape == x.shape and y.dtype == x.dtype
    assert bool(jnp.all(y == x))

    # Pallas copy path (for callers that need a fresh buffer).
    z = identity_copy_pallas(x)
    z = jax.block_until_ready(z)
    assert z.shape == x.shape and z.dtype == x.dtype
    assert bool(jnp.all(z == x))

    # Odd-sized tensor exercises the padded lane-dense fallback.
    w = jax.random.normal(jax.random.PRNGKey(1), (3, 5, 7), dtype=jnp.float32)
    wz = jax.block_until_ready(identity_copy_pallas(w))
    assert wz.shape == w.shape and wz.dtype == w.dtype
    assert bool(jnp.all(wz == w))

    print("KERNEL_OK")
</pallas_src>

<mosaic_0001>
module attributes {stable_mosaic.version = 11 : i64} {
  func.func @_copy_kernel(%arg0: i32, %arg1: memref<1x2048xf32, #tpu.memory_space<vmem>>, %arg2: memref<1x2048xf32, #tpu.memory_space<vmem>>) attributes {dimension_semantics = [#tpu.dimension_semantics<parallel>], iteration_bounds = array<i64: 1>, scalar_prefetch = 0 : i64, scratch_operands = 0 : i64, tpu.core_type = #tpu.core_type<tc>, window_params = [{transform_indices = @transform_0, window_bounds = array<i64: 1, 2048>}, {transform_indices = @transform_1, window_bounds = array<i64: 1, 2048>}]} {
    %c0 = arith.constant 0 : index
    %c0_0 = arith.constant 0 : index
    %0 = vector.load %arg1[%c0, %c0_0] : memref<1x2048xf32, #tpu.memory_space<vmem>>, vector<1x2048xf32>
    %c0_1 = arith.constant 0 : index
    %c0_2 = arith.constant 0 : index
    %1 = vector.load %arg2[%c0_1, %c0_2] : memref<1x2048xf32, #tpu.memory_space<vmem>>, vector<1x2048xf32>
    tpu.vector_store %arg2[%c0_1, %c0_2], %0 {strides = array<i32>} : memref<1x2048xf32, #tpu.memory_space<vmem>>, vector<1x2048xf32>,
    return
  }
  func.func @transform_0(%arg0: i32) -> (i32, i32) {
    %c0_i32 = arith.constant 0 : i32
    %c0_i32_0 = arith.constant 0 : i32
    return %arg0, %c0_i32 : i32, i32
  }
  func.func @transform_1(%arg0: i32) -> (i32, i32) {
    %c0_i32 = arith.constant 0 : i32
    %c0_i32_0 = arith.constant 0 : i32
    return %arg0, %c0_i32 : i32, i32
  }
}

</mosaic_0001>

<bundles_post_ra>
// kernel: tpu_custom_call.1
= control target key start
LH: loop header
LB: loop body
LE: loop exit
PB: predicated region body
PF: predicated region fallthrough
CT: control target
= control target key end

     0   :  { %6 = vsyncpa [#allocation3], 0  ;;  %s104_s0 = inlined_call_operand.hbm [shape: f32[1,2048], index: 0, kind: input, shape index: {}]   ;;  %s105_s1 = inlined_call_operand.hbm [shape: f32[1,2048], index: 1, kind: output, shape index: {}]  }
   0x1   :  { %7 = vsyncpa [#allocation4], 0  ;;  %s86_s6 = smov [#allocation2]  }
   0x2   :  { %s14_s7 = sshll.u32 %s86_s6, 4  ;;  %s15_s7 = int_to_ptr.vmem [resolvable:$true] %s14_s7 }
   0x3   :  { %s50_s8 = scalar_lea.vmem %s15_s7, 256  ;;  %p55_p1 = scmp.lt.s32.totalorder %s15_s7, %s15_s7 }
   0x4   :  { %p51_p0 = scmp.ne.s32.totalorder %s15_s7, %s50_s8  ;;  %p56_p2 = scmp.lt.s32.totalorder %s50_s8, %s50_s8 }
   0x6   :  { %p57_p3 = por %p56_p2, %p55_p1 }
   0x8   :  { %p58_p4 = pnand %p57_p3, %p51_p0 }
   0xa   :  { %61 = shalt.err (!%p58_p4)
}
   0xb   :  { %17 = dma.hbm_to_vmem [thread:$0]  %s104_s0, 256, %s15_s7, [#allocation3]  }
   0xc   :  { %82 = dma.done.wait [#allocation3], 256  }
   0xd   :  { %83 = vsyncadd [#allocation3], 4294967040  ;;  %s87_s11 = smov [#allocation5]   ;;  %v21_v0 = vld [vmem:[#allocation2] sm:$0xff]  ;;  %v22_v1 = vld [vmem:[#allocation2 + $0x8] sm:$0xff] }
   0xe   :  { %s31_s12 = sshll.u32 %s87_s11, 4  ;;  %23 = vst [vmem:[#allocation5] sm:$0xff] %v21_v0  ;;  %24 = vst [vmem:[#allocation5 + $0x8] sm:$0xff] %v22_v1  ;;  %s32_s12 = int_to_ptr.vmem [resolvable:$true] %s31_s12 }
   0xf   :  { %s62_s13 = scalar_lea.vmem %s32_s12, 256  ;;  %p67_p6 = scmp.lt.s32.totalorder %s32_s12, %s32_s12 }
  0x10   :  { %p63_p5 = scmp.ne.s32.totalorder %s32_s12, %s62_s13  ;;  %p68_p7 = scmp.lt.s32.totalorder %s62_s13, %s62_s13 }
  0x12   :  { %p69_p8 = por %p68_p7, %p67_p6 }
  0x14   :  { %p70_p9 = pnand %p69_p8, %p63_p5 }
  0x16   :  { %73 = shalt.err (!%p70_p9)
}
  0x17   :  { %34 = dma.vmem_to_hbm [thread:$0]  %s32_s12, 256, %s105_s1, [#allocation4]  }
  0x18   :  { %84 = dma.done.wait [#allocation4], 256  }
  0x19   :  { %85 = vsyncadd [#allocation4], 4294967040 }
  0x1a   :  { %38 = vsyncpa [#allocation3], 1 }
  0x1b   :  { %39 = vsyncpa [#allocation4], 1 }

</bundles_post_ra>
